<compile_context>
chip_gen: v7x
topology: tpu7x:2x2x1
jax: 0.10.0
libtpu: 0.0.40
codegen_flags: <defaults>
</compile_context>

<pallas_src>
import functools
import math

import jax
import jax.numpy as jnp
from jax.experimental import pallas as pl
from jax.experimental.pallas import tpu as pltpu


# ------------------------------ tiling helpers --------------------------------

def _tile_size(dim, target, align):
    """Largest block size <= target that divides dim and respects alignment."""
    if dim <= target:
        return dim
    t = (target // align) * align
    while t >= align:
        if dim % t == 0:
            return t
        t -= align
    return dim


def _pick_block_tokens(T, C, target=128):
    """Number of tokens (multiple of chunk_size C, dividing T) per MXU block."""
    if T <= target:
        return T
    bt = (target // C) * C
    while bt > C and T % bt:
        bt -= C
    return bt if bt >= C and T % bt == 0 else C


# ----------------------------- tiled matmul (+bias) ---------------------------

def _matmul_bias_kernel(x_ref, w_ref, b_ref, o_ref, acc_ref, *, activation):
    @pl.when(pl.program_id(2) == 0)
    def _init():
        acc_ref[...] = jnp.zeros_like(acc_ref)

    acc_ref[...] += jnp.dot(x_ref[...].astype(jnp.bfloat16), w_ref[...],
                            preferred_element_type=jnp.float32)

    @pl.when(pl.program_id(2) == pl.num_programs(2) - 1)
    def _fin():
        y = acc_ref[...] + b_ref[...]
        if activation == "gelu":
            # TODO(synk): PyTorch nn.GELU default is exact erf; tanh approx used here.
            y = jax.nn.gelu(y, approximate=True)
        o_ref[...] = y


def matmul_bias(x, w, b, activation="none", *, tm=256, tn=256, tk=512):
    """(M,K) @ (K,N) + b, bf16 MXU inputs, f32 accumulate, optional fused GELU."""
    M, K = x.shape
    K2, N = w.shape
    assert K == K2
    tm = _tile_size(M, tm, 8)
    tn = _tile_size(N, tn, 128)
    tk = _tile_size(K, tk, 128)
    kernel = functools.partial(_matmul_bias_kernel, activation=activation)
    return pl.pallas_call(
        kernel,
        out_shape=jax.ShapeDtypeStruct((M, N), jnp.float32),
        grid_spec=pltpu.PrefetchScalarGridSpec(
            num_scalar_prefetch=0,
            grid=(M // tm, N // tn, K // tk),
            in_specs=[
                pl.BlockSpec((tm, tk), lambda i, j, k: (i, k)),
                pl.BlockSpec((tk, tn), lambda i, j, k: (k, j)),
                pl.BlockSpec((1, tn), lambda i, j, k: (0, j)),
            ],
            out_specs=pl.BlockSpec((tm, tn), lambda i, j, k: (i, j)),
            scratch_shapes=[pltpu.VMEM((tm, tn), jnp.float32)],
        ),
        compiler_params=pltpu.CompilerParams(
            dimension_semantics=("parallel", "parallel", "arbitrary")),
    )(x, w, b.reshape(1, N))


# --------------------- fused LayerNorm + matmul (+bias) -----------------------

def _ln_matmul_bias_kernel(x_ref, g_ref, be_ref, w_ref, b_ref, o_ref, *,
                           eps, activation):
    x = x_ref[...]
    mean = jnp.mean(x, axis=-1, keepdims=True)
    var = jnp.mean(jnp.square(x - mean), axis=-1, keepdims=True)
    xn = (x - mean) * jax.lax.rsqrt(var + eps)
    xn = xn * g_ref[...] + be_ref[...]
    y = jnp.dot(xn.astype(jnp.bfloat16), w_ref[...],
                preferred_element_type=jnp.float32) + b_ref[...]
    if activation == "gelu":
        # TODO(synk): PyTorch nn.GELU default is exact erf; tanh approx used here.
        y = jax.nn.gelu(y, approximate=True)
    o_ref[...] = y


def ln_matmul_bias(x, gamma, beta, w, b, activation="none", *,
                   eps=1e-5, tm=256, tn=256):
    """LayerNorm(x) @ w + b (LN fused as a prologue; K kept whole per block)."""
    M, K = x.shape
    K2, N = w.shape
    assert K == K2
    tm = _tile_size(M, tm, 8)
    tn = _tile_size(N, tn, 128)
    kernel = functools.partial(_ln_matmul_bias_kernel, eps=eps, activation=activation)
    return pl.pallas_call(
        kernel,
        out_shape=jax.ShapeDtypeStruct((M, N), jnp.float32),
        grid_spec=pltpu.PrefetchScalarGridSpec(
            num_scalar_prefetch=0,
            grid=(M // tm, N // tn),
            in_specs=[
                pl.BlockSpec((tm, K), lambda i, j: (i, 0)),
                pl.BlockSpec((1, K), lambda i, j: (0, 0)),
                pl.BlockSpec((1, K), lambda i, j: (0, 0)),
                pl.BlockSpec((K, tn), lambda i, j: (0, j)),
                pl.BlockSpec((1, tn), lambda i, j: (0, j)),
            ],
            out_specs=pl.BlockSpec((tm, tn), lambda i, j: (i, j)),
        ),
        compiler_params=pltpu.CompilerParams(
            dimension_semantics=("parallel", "parallel")),
    )(x, gamma.reshape(1, K), beta.reshape(1, K), w, b.reshape(1, N))


# ------------------------------- final LayerNorm ------------------------------

def _layernorm_kernel(x_ref, g_ref, b_ref, o_ref, *, eps):
    x = x_ref[...]
    mean = jnp.mean(x, axis=-1, keepdims=True)
    var = jnp.mean(jnp.square(x - mean), axis=-1, keepdims=True)
    xn = (x - mean) * jax.lax.rsqrt(var + eps)
    o_ref[...] = xn * g_ref[...] + b_ref[...]


def layernorm(x, gamma, beta, eps=1e-5, *, tm=256):
    M, D = x.shape
    tm = _tile_size(M, tm, 8)
    kernel = functools.partial(_layernorm_kernel, eps=eps)
    return pl.pallas_call(
        kernel,
        out_shape=jax.ShapeDtypeStruct((M, D), jnp.float32),
        grid_spec=pltpu.PrefetchScalarGridSpec(
            num_scalar_prefetch=0,
            grid=(M // tm,),
            in_specs=[
                pl.BlockSpec((tm, D), lambda i: (i, 0)),
                pl.BlockSpec((1, D), lambda i: (0, 0)),
                pl.BlockSpec((1, D), lambda i: (0, 0)),
            ],
            out_specs=pl.BlockSpec((tm, D), lambda i: (i, 0)),
        ),
        compiler_params=pltpu.CompilerParams(dimension_semantics=("parallel",)),
    )(x, gamma.reshape(1, D), beta.reshape(1, D))


# --------------------------- hybrid chunked attention -------------------------

def _rope(x, cos, sin):
    # local (within-chunk) rotary position encoding
    d2 = x.shape[-1] // 2
    x1 = x[:, :d2]
    x2 = x[:, d2:]
    rot = jnp.concatenate([-x2, x1], axis=-1)
    return x * cos + rot * sin


def _hqlt_attn_kernel(proj_ref, cos_ref, sin_ref, o_ref, s_ref, *,
                      n_head, head_dim, chunk_size, block_tokens, scale):
    """One batch element per grid step; heads looped in-kernel.

    proj_ref: (1, T, 4*D) stacked [q | k | v | gate] projections.
    o_ref:    (1, T, D) lane-dense attention output.
    s_ref:    (1, H, dh, dh) final recurrent memory state per head.
    """
    H, dh, C, GC = n_head, head_dim, chunk_size, block_tokens
    T = proj_ref.shape[1]
    D = H * dh
    n_blocks = T // GC

    # block-level masks, built once (hoisted out of all loops)
    row = jax.lax.broadcasted_iota(jnp.int32, (GC, GC), 0)
    col = jax.lax.broadcasted_iota(jnp.int32, (GC, GC), 1)
    intra_mask = jnp.logical_and(row // C == col // C, col <= row)   # same-chunk causal
    lower_mask = (col // C) < (row // C)                             # earlier chunks in block

    # per-head recurrent memory states carried across blocks
    states = [jnp.zeros((dh, dh), jnp.float32) for _ in range(H)]

    # TODO(synk): for long T, stream T via an extra "arbitrary" grid axis +
    #             lax.fori_loop instead of this static (unrolled) block loop.
    for bi in range(n_blocks):
        sl = pl.ds(bi * GC, GC)
        cos_b = cos_ref[sl, :]
        sin_b = sin_ref[sl, :]
        proj_b = proj_ref[0, sl, :]                                   # (GC, 4D) f32
        head_outs = []
        for h in range(H):
            q = _rope(proj_b[:, h * dh:(h + 1) * dh], cos_b, sin_b)
            k = _rope(proj_b[:, D + h * dh:D + (h + 1) * dh], cos_b, sin_b)
            v = proj_b[:, 2 * D + h * dh:2 * D + (h + 1) * dh]
            g = jax.nn.sigmoid(proj_b[:, 3 * D + h * dh:3 * D + (h + 1) * dh])

            qb = q.astype(jnp.bfloat16)
            kb = k.astype(jnp.bfloat16)
            vb = v.astype(jnp.bfloat16)

            # one big score matmul per block (shared by intra + within-block inter)
            raw = jnp.dot(qb, kb.T, preferred_element_type=jnp.float32) * scale

            # intra-chunk causal softmax attention (quadratic branch)
            s_intra = jnp.where(intra_mask, raw, -1e30)
            m = jnp.max(s_intra, axis=-1, keepdims=True)
            p = jnp.exp(s_intra - m)
            p = p * pl.reciprocal(jnp.sum(p, axis=-1, keepdims=True), approx=True)
            o_intra = jnp.dot(p.astype(jnp.bfloat16), vb,
                              preferred_element_type=jnp.float32)

            # inter-chunk linear attention: carried memory + strictly
            # block-lower-triangular (un-softmaxed) within-block correction
            corr = jnp.where(lower_mask, raw, 0.0)
            o_inter = (jnp.dot(qb, states[h].astype(jnp.bfloat16),
                               preferred_element_type=jnp.float32) * scale
                       + jnp.dot(corr.astype(jnp.bfloat16), vb,
                                 preferred_element_type=jnp.float32))

            # memory-gated blend of quadratic (local) and linear (memory) branches
            head_outs.append(g * o_intra + (1.0 - g) * o_inter)

            # update memory with every chunk in this block (identity qk activation)
            states[h] = states[h] + jnp.dot(kb.T, vb,
                                            preferred_element_type=jnp.float32)

        o_ref[0, sl, :] = jnp.concatenate(head_outs, axis=-1)         # 128-lane store

    for h in range(H):
        s_ref[0, h] = states[h]                                       # "past_key_values"


def hqlt_attention(proj, cos, sin, *, n_head, head_dim, chunk_size):
    B, T, D4 = proj.shape
    D = n_head * head_dim
    assert D4 == 4 * D
    assert T % chunk_size == 0  # TODO(synk): ragged last chunk not handled
    block_tokens = _pick_block_tokens(T, chunk_size)
    scale = 1.0 / math.sqrt(head_dim)
    kernel = functools.partial(
        _hqlt_attn_kernel, n_head=n_head, head_dim=head_dim,
        chunk_size=chunk_size, block_tokens=block_tokens, scale=scale)
    out, state = pl.pallas_call(
        kernel,
        out_shape=(
            jax.ShapeDtypeStruct((B, T, D), jnp.float32),
            jax.ShapeDtypeStruct((B, n_head, head_dim, head_dim), jnp.float32),
        ),
        grid_spec=pltpu.PrefetchScalarGridSpec(
            num_scalar_prefetch=0,
            grid=(B,),
            in_specs=[
                pl.BlockSpec((1, T, D4), lambda b: (b, 0, 0)),
                pl.BlockSpec((T, head_dim), lambda b: (0, 0)),
                pl.BlockSpec((T, head_dim), lambda b: (0, 0)),
            ],
            out_specs=(
                pl.BlockSpec((1, T, D), lambda b: (b, 0, 0)),
                pl.BlockSpec((1, n_head, head_dim, head_dim),
                             lambda b: (b, 0, 0, 0)),
            ),
        ),
        compiler_params=pltpu.CompilerParams(dimension_semantics=("parallel",)),
    )(proj, cos, sin)
    return out, state


# ------------------------------ model glue -----------------------------------

def init_hqlt_params(key, hidden_size, n_layer):
    D = hidden_size

    def normal(k, shape, scale=0.02):
        # weights stored bf16 for the MXU; LN params / biases stay f32
        return (scale * jax.random.normal(k, shape, dtype=jnp.float32)
                ).astype(jnp.bfloat16)

    params = {"layers": []}
    keys = jax.random.split(key, n_layer)
    for l in range(n_layer):
        k = jax.random.split(keys[l], 4)
        params["layers"].append(dict(
            ln1_g=jnp.ones((D,), jnp.float32), ln1_b=jnp.zeros((D,), jnp.float32),
            # fused [q | k | v | gate] projection
            w_qkvg=normal(k[0], (D, 4 * D)), b_qkvg=jnp.zeros((4 * D,), jnp.float32),
            w_out=normal(k[1], (D, D)), b_out=jnp.zeros((D,), jnp.float32),
            ln2_g=jnp.ones((D,), jnp.float32), ln2_b=jnp.zeros((D,), jnp.float32),
            w_fc1=normal(k[2], (D, 4 * D)), b_fc1=jnp.zeros((4 * D,), jnp.float32),
            w_fc2=normal(k[3], (4 * D, D)), b_fc2=jnp.zeros((D,), jnp.float32),
        ))
    params["lnf_g"] = jnp.ones((D,), jnp.float32)
    params["lnf_b"] = jnp.zeros((D,), jnp.float32)
    return params


def local_rope_tables(chunk_size, dh):
    pos = jnp.arange(chunk_size, dtype=jnp.float32)[:, None]
    d2 = dh // 2
    inv_freq = 1.0 / (10000.0 ** (jnp.arange(d2, dtype=jnp.float32) / d2))
    ang = pos * inv_freq[None, :]
    ang = jnp.concatenate([ang, ang], axis=-1)  # (C, dh)
    return jnp.cos(ang), jnp.sin(ang)


def hqlt_forward(params, input_embeds, pkv, *, n_head, chunk_size):
    """input_embeds: (T, B, D) -> (out (T, B, D), new past_key_values)."""
    # TODO(synk): incremental decoding with a populated Cache()/pkv is not
    # implemented; pkv is treated as the empty cache (fresh memory states).
    # TODO(synk): dropout (pdrop) omitted — identity at inference.
    T, B, D = input_embeds.shape
    H = n_head
    dh = D // H
    assert T % chunk_size == 0
    x = jnp.transpose(input_embeds, (1, 0, 2)).astype(jnp.float32)  # (B, T, D)
    cos_c, sin_c = local_rope_tables(chunk_size, dh)
    cos_t = jnp.tile(cos_c, (T // chunk_size, 1))                   # (T, dh)
    sin_t = jnp.tile(sin_c, (T // chunk_size, 1))
    M = B * T
    new_pkv = []
    for layer in params["layers"]:
        # fused LN1 + [q|k|v|gate] projection — no per-head transposes needed
        proj = ln_matmul_bias(x.reshape(M, D), layer["ln1_g"], layer["ln1_b"],
                              layer["w_qkvg"], layer["b_qkvg"])      # (M, 4D)
        attn, mem_state = hqlt_attention(
            proj.reshape(B, T, 4 * D), cos_t, sin_t,
            n_head=H, head_dim=dh, chunk_size=chunk_size)            # (B,T,D), (B,H,dh,dh)
        x = x + matmul_bias(attn.reshape(M, D), layer["w_out"],
                            layer["b_out"]).reshape(B, T, D)

        # fused LN2 + fc1 + GELU, then tiled fc2
        h1 = ln_matmul_bias(x.reshape(M, D), layer["ln2_g"], layer["ln2_b"],
                            layer["w_fc1"], layer["b_fc1"], activation="gelu")
        x = x + matmul_bias(h1, layer["w_fc2"], layer["b_fc2"]).reshape(B, T, D)
        new_pkv.append(mem_state)

    x = layernorm(x.reshape(M, D), params["lnf_g"], params["lnf_b"]).reshape(B, T, D)
    return jnp.transpose(x, (1, 0, 2)), tuple(new_pkv)


# --------------------------------- main ---------------------------------------

if __name__ == "__main__":
    hidden_size = 128   # == input_size (module asserts equality)
    n_head = 2
    n_layer = 2
    chunk_size = 8
    T = 16              # max_seq_length time steps in the training path
    B = 2

    key = jax.random.PRNGKey(0)
    pkey, xkey = jax.random.split(key)
    params = init_hqlt_params(pkey, hidden_size, n_layer)
    input_embeds = jax.random.normal(xkey, (T, B, hidden_size), dtype=jnp.float32)

    pkv = None  # equivalent of get_zero_internal_state() -> empty Cache()
    out, new_pkv = hqlt_forward(params, input_embeds, pkv,
                                n_head=n_head, chunk_size=chunk_size)
    jax.block_until_ready(out)
    assert out.shape == (T, B, hidden_size)
    assert len(new_pkv) == n_layer
    assert new_pkv[0].shape == (B, n_head, hidden_size // n_head, hidden_size // n_head)
    print("KERNEL_OK")
</pallas_src>

<mosaic_0001>
module attributes {stable_mosaic.version = 11 : i64} {
  func.func @_ln_matmul_bias_kernel(%arg0: i32, %arg1: i32, %arg2: memref<32x128xf32, #tpu.memory_space<vmem>>, %arg3: memref<1x128xf32, #tpu.memory_space<vmem>>, %arg4: memref<1x128xf32, #tpu.memory_space<vmem>>, %arg5: memref<128x256xbf16, #tpu.memory_space<vmem>>, %arg6: memref<1x256xf32, #tpu.memory_space<vmem>>, %arg7: memref<32x256xf32, #tpu.memory_space<vmem>>) attributes {dimension_semantics = [#tpu.dimension_semantics<parallel>, #tpu.dimension_semantics<parallel>], iteration_bounds = array<i64: 1, 2>, scalar_prefetch = 0 : i64, scratch_operands = 0 : i64, tpu.core_type = #tpu.core_type<tc>, window_params = [{transform_indices = @transform_0, window_bounds = array<i64: 32, 128>}, {pipeline_mode = #tpu.pipeline_mode<synchronous>, transform_indices = @transform_1, window_bounds = array<i64: 1, 128>}, {pipeline_mode = #tpu.pipeline_mode<synchronous>, transform_indices = @transform_2, window_bounds = array<i64: 1, 128>}, {transform_indices = @transform_3, window_bounds = array<i64: 128, 256>}, {transform_indices = @transform_4, window_bounds = array<i64: 1, 256>}, {transform_indices = @transform_5, window_bounds = array<i64: 32, 256>}]} {
    %c0 = arith.constant 0 : index
    %c0_0 = arith.constant 0 : index
    %0 = vector.load %arg2[%c0, %c0_0] : memref<32x128xf32, #tpu.memory_space<vmem>>, vector<32x128xf32>
    %cst = arith.constant dense<0.000000e+00> : vector<32xf32>
    %1 = vector.multi_reduction <add>, %0, %cst [1] : vector<32x128xf32> to vector<32xf32>
    %2 = vector.shape_cast %1 : vector<32xf32> to vector<32x1xf32>
    %cst_1 = arith.constant 1.280000e+02 : f32
    %3 = vector.broadcast %cst_1 : f32 to vector<32x1xf32>
    %4 = arith.divf %2, %3 : vector<32x1xf32>
    %5 = vector.broadcast %4 : vector<32x1xf32> to vector<32x128xf32>
    %6 = arith.subf %0, %5 : vector<32x128xf32>
    %7 = arith.mulf %6, %6 : vector<32x128xf32>
    %cst_2 = arith.constant dense<0.000000e+00> : vector<32xf32>
    %8 = vector.multi_reduction <add>, %7, %cst_2 [1] : vector<32x128xf32> to vector<32xf32>
    %9 = vector.shape_cast %8 : vector<32xf32> to vector<32x1xf32>
    %cst_3 = arith.constant 1.280000e+02 : f32
    %10 = vector.broadcast %cst_3 : f32 to vector<32x1xf32>
    %11 = arith.divf %9, %10 : vector<32x1xf32>
    %12 = vector.broadcast %4 : vector<32x1xf32> to vector<32x128xf32>
    %13 = arith.subf %0, %12 : vector<32x128xf32>
    %cst_4 = arith.constant 9.99999974E-6 : f32
    %14 = vector.broadcast %cst_4 : f32 to vector<32x1xf32>
    %15 = arith.addf %11, %14 : vector<32x1xf32>
    %16 = math.rsqrt %15 : vector<32x1xf32>
    %17 = vector.broadcast %16 : vector<32x1xf32> to vector<32x128xf32>
    %18 = arith.mulf %13, %17 : vector<32x128xf32>
    %c0_5 = arith.constant 0 : index
    %c0_6 = arith.constant 0 : index
    %19 = vector.load %arg3[%c0_5, %c0_6] : memref<1x128xf32, #tpu.memory_space<vmem>>, vector<1x128xf32>
    %20 = vector.broadcast %19 : vector<1x128xf32> to vector<32x128xf32>
    %21 = arith.mulf %18, %20 : vector<32x128xf32>
    %c0_7 = arith.constant 0 : index
    %c0_8 = arith.constant 0 : index
    %22 = vector.load %arg4[%c0_7, %c0_8] : memref<1x128xf32, #tpu.memory_space<vmem>>, vector<1x128xf32>
    %23 = vector.broadcast %22 : vector<1x128xf32> to vector<32x128xf32>
    %24 = arith.addf %21, %23 : vector<32x128xf32>
    %25 = arith.truncf %24 : vector<32x128xf32> to vector<32x128xbf16>
    %c0_9 = arith.constant 0 : index
    %c0_10 = arith.constant 0 : index
    %26 = vector.load %arg5[%c0_9, %c0_10] : memref<128x256xbf16, #tpu.memory_space<vmem>>, vector<128x256xbf16>
    %cst_11 = arith.constant dense<0.000000e+00> : vector<32x256xf32>
    %27 = tpu.matmul %25, %26, %cst_11 {dimension_numbers = #tpu.dot_dimension_numbers<[1], [0], [0], [1], [0, 0, 1, 1], [], []>} : vector<32x128xbf16>, vector<128x256xbf16>, vector<32x256xf32> -> vector<32x256xf32>
    %c0_12 = arith.constant 0 : index
    %c0_13 = arith.constant 0 : index
    %28 = vector.load %arg6[%c0_12, %c0_13] : memref<1x256xf32, #tpu.memory_space<vmem>>, vector<1x256xf32>
    %29 = vector.broadcast %28 : vector<1x256xf32> to vector<32x256xf32>
    %30 = arith.addf %27, %29 : vector<32x256xf32>
    %c0_14 = arith.constant 0 : index
    %c0_15 = arith.constant 0 : index
    %31 = vector.load %arg7[%c0_14, %c0_15] : memref<32x256xf32, #tpu.memory_space<vmem>>, vector<32x256xf32>
    tpu.vector_store %arg7[%c0_14, %c0_15], %30 {strides = array<i32>} : memref<32x256xf32, #tpu.memory_space<vmem>>, vector<32x256xf32>,
    return
  }
  func.func @transform_0(%arg0: i32, %arg1: i32) -> (i32, i32) {
    %c0_i32 = arith.constant 0 : i32
    %c0_i32_0 = arith.constant 0 : i32
    return %arg0, %c0_i32 : i32, i32
  }
  func.func @transform_1(%arg0: i32, %arg1: i32) -> (i32, i32) {
    %c0_i32 = arith.constant 0 : i32
    %c0_i32_0 = arith.constant 0 : i32
    %c0_i32_1 = arith.constant 0 : i32
    return %c0_i32, %c0_i32_0 : i32, i32
  }
  func.func @transform_2(%arg0: i32, %arg1: i32) -> (i32, i32) {
    %c0_i32 = arith.constant 0 : i32
    %c0_i32_0 = arith.constant 0 : i32
    %c0_i32_1 = arith.constant 0 : i32
    return %c0_i32, %c0_i32_0 : i32, i32
  }
  func.func @transform_3(%arg0: i32, %arg1: i32) -> (i32, i32) {
    %c0_i32 = arith.constant 0 : i32
    %c0_i32_0 = arith.constant 0 : i32
    return %c0_i32, %arg1 : i32, i32
  }
  func.func @transform_4(%arg0: i32, %arg1: i32) -> (i32, i32) {
    %c0_i32 = arith.constant 0 : i32
    %c0_i32_0 = arith.constant 0 : i32
    return %c0_i32, %arg1 : i32, i32
  }
  func.func @transform_5(%arg0: i32, %arg1: i32) -> (i32, i32) {
    %c0_i32 = arith.constant 0 : i32
    return %arg0, %arg1 : i32, i32
  }
}

</mosaic_0001>

<bundles_post_ra>
// kernel: tpu_custom_call.1
= control target key start
LH: loop header
LB: loop body
LE: loop exit
PB: predicated region body
PF: predicated region fallthrough
CT: control target
= control target key end

     0   :  { %10 = vsyncpa [#allocation3], 0  ;;  %s1296_s0 = inlined_call_operand.hbm [shape: f32[32,128], index: 0, kind: input, shape index: {}]   ;;  %s1297_s1 = inlined_call_operand.vmem [shape: f32[1,128], index: 1, kind: input, shape index: {}]   ;;  %s1298_s2 = inlined_call_operand.vmem [shape: f32[1,128], index: 2, kind: input, shape index: {}]   ;;  %s1299_s3 = inlined_call_operand.hbm [shape: bf16[128,512], index: 3, kind: input, shape index: {}]   ;;  %s1300_s4 = inlined_call_operand.vmem [shape: f32[1,512], index: 4, kind: input, shape index: {}]   ;;  %s1301_s5 = inlined_call_operand.hbm [shape: f32[32,512], index: 5, kind: output, shape index: {}]  }
   0x1   :  { %11 = vsyncpa [#allocation6], 0 }
   0x2   :  { %13 = vsyncpa [#allocation6 + $0x1], 0 }
   0x3   :  { %14 = vsyncpa [#allocation4], 0 }
   0x4   :  { %16 = vsyncpa [#allocation4 + $0x1], 0  ;;  %s1022_s18 = smov 0   ;;  %s1024_s19 = smov 0  }
   0x5   :  { %s1026_s20 = smov 0   ;;  %s1028_s21 = smov 0  }
   0x6   :  { %s1030_s22 = smov 0   ;;  %s1032_s23 = smov 0  }
   0x7 LB: > { %1312 = sst [smem:[#allocation11_spill]] %s980_s23  ;;  %s670_s24 = sadd.s32 4294967295, %s980_s23   ;;  %s980_s23 = sphi %s1032_s23, %s22_s23   ;;  %s976_s22 = sphi %s1030_s22, %s1335_s22   ;;  %s972_s21 = sphi %s1028_s21, %s1334_s21   ;;  %s968_s20 = sphi %s1026_s20, %s1333_s20   ;;  %s964_s19 = sphi %s1024_s19, %s1332_s19   ;;  %s960_s18 = sphi %s1022_s18, %s1331_s18  }
   0x8   : > { %s671_s25 = sadd.s32 4294967294, %s980_s23   ;;  %p116_p0 = scmp.ne.s32.totalorder %s968_s20, %s964_s19 }
   0x9   : > { %p117_p1 = scmp.eq.s32.totalorder %s980_s23, 0  ;;  %p122_p2 = scmp.ne.s32.totalorder %s964_s19, %s960_s18 }
   0xa   : > { %p1059_p3 = scmp.eq.s32.totalorder %s670_s24, 0  ;;  %p174_p5 = scmp.eq.s32.totalorder %s670_s24, 1 }
   0xb   : > { %p1063_p4 = por %p117_p1, %p116_p0  ;;  %p180_p7 = scmp.eq.s32.totalorder %s671_s25, 1 }
   0xc   : > { %s1313_s26 = scalar_select %p1059_p3, 1, 0 }
   0xd   : > { %p1069_p6 = por %p1059_p3, %p122_p2  ;;  %p1073_p8 = por %p174_p5, %p116_p0 }
   0xe   : > { %p672_p9 = scmp.ge.s32.totalorder %s980_s23, 1  ;;  %p1078_p10 = por %p180_p7, %p122_p2 }
   0xf   : > { %s1315_s28 = scalar_select %p1069_p6, 1, 0 }
  0x10   : > { %s1316_s29 = scalar_select %p1073_p8, 1, 0 }
  0x11   : > { %s1317_s30 = scalar_select %p1078_p10, 1, 0 }
  0x12   : > { %p187_p11 = scmp.lt.s32.totalorder %s980_s23, 3  ;;  %s982_s7 = smov [#allocation2]  }
  0x13   : > { %s202_s8 = sshll.u32 %s982_s7, 4  ;;  %p745_p1 = scmp.lt.s32.totalorder %s980_s23, 2  ;;  %s1087_s8 = int_to_ptr.vmem [resolvable:$true] %s202_s8 }
  0x14   : > { %p1083_p12 = pnand %p672_p9, %p187_p11  ;;  %s31_s11 = sadd.s32 1, %s976_s22 }
  0x15   : > { %p1101_p2 = pnand %p745_p1, %p1063_p4  ;;  %s836_s14 = scalar_lea.hbm %s1296_s0, 512 }
  0x16   : > { %s1318_s6 = scalar_select %p1083_p12, 1, 0 }
  0x17   : > { %p732_p13 = pneg %p1083_p12  ;;  %p837_p7 = scmp.ne.s32.totalorder %s1296_s0, %s836_s14 }
  0x18   : > { %s1320_s10 = scalar_select %p1101_p2, 1, 0 }
  0x19   : > { %p1095_p5 = pnand %p732_p13, %p1059_p3  ;;  %p843_p4 = scmp.lt.u32.totalorder %s836_s14, %s1296_s0 }
  0x1b   : > { %p838_p9 = pneg %p1095_p5 }
  0x1d   : > { %p839_p11 = pnand %p838_p9, %p837_p7 }
  0x1f   : > { %p840_p13 = pneg %p839_p11 }
  0x21   : > { %p845_p1 = pnand %p843_p4, %p840_p13 }
  0x23   : > { %848 = shalt.err (!%p845_p1)
}
  0x24   : > { %s849_s25 = scalar_lea.vmem %s1087_s8, 512  ;;  %p857_p6 = scmp.lt.s32.totalorder %s1087_s8, %s1087_s8 }
  0x25   : > { %p850_p0 = scmp.ne.s32.totalorder %s1087_s8, %s849_s25  ;;  %p858_p3 = scmp.lt.s32.totalorder %s849_s25, %s849_s25 }
  0x27   : > { %p852_p10 = pnand %p850_p0, %p838_p9  ;;  %p859_p12 = por %p858_p3, %p857_p6 }
  0x29   : > { %p853_p8 = pneg %p852_p10 }
  0x2b   : > { %p860_p2 = pnand %p859_p12, %p853_p8 }
  0x2d   : > { %863 = shalt.err (!%p860_p2)
}
  0x2e   : > { %s1310_s27 = smov 128   ;;  %s1311_s7 = smov 8  }
  0x2f   : > { %735 = dma.hbm_to_vmem [thread:$0]  (!%p1095_p5), %s1296_s0, 512, %s1087_s8, [#allocation3], %s1310_s27, %s1310_s27, %s1311_s7  }
  0x30   : > { %p32_p3 = scmp.ge.s32.totalorder %s31_s11, 2  ;;  %s109_s14 = sadd.s32 1, %s968_s20 }
  0x31   : > { %s222_s15 = sand.u32 1, %s968_s20   ;;  %s706_s24 = sshll.u32 %s976_s22, 7 }
  0x32   : > { %s1337_s11 = smov (%p32_p3, %s31_s11), 0  ;;  %s675_s16 = sshll.u32 %s222_s15, 7 }
  0x33   : > { %s106_s17 = ssub.s32 %s976_s22, %s1337_s11  ;;  %s1140_s23 = scalar_lea.hbm %s1299_s3, %s706_s24 }
  0x34   : > { %p107_p6 = scmp.eq.s32.totalorder %s106_s17, 0  ;;  %s226_s8 = scalar_lea.vmem [#allocation5], %s675_s16 }
  0x35   : > { %s233_s12 = sshll.u32 %s226_s8, 4  ;;  %s1147_s27 = scalar_lea.sflag [#allocation6], %s222_s15  ;;  %s1145_s12 = int_to_ptr.vmem [resolvable:$true] %s233_s12 }
  0x36   : > { %s1143_s13 = scalar_select %p107_p6, %s968_s20, %s109_s14  }
  0x37   : > { %s864_s7 = scalar_lea.hbm %s1140_s23, 2048  ;;  %p1321_p10 = scmp.ne.s32.totalorder %s1320_s10, 0 }
  0x38   : > { %p865_p8 = scmp.ne.s32.totalorder %s1140_s23, %s864_s7  ;;  %s869_s9 = scalar_lea.hbm %s1299_s3, 4096 }
  0x39   : > { %p866_p12 = pneg %p1321_p10  ;;  %p870_p2 = scmp.lt.u32.totalorder %s1140_s23, %s1299_s3 }
  0x3a   : > { %p871_p7 = scmp.lt.u32.totalorder %s869_s9, %s864_s7  ;;  %p873_p11 = scmp.lt.u32.totalorder %s864_s7, %s1140_s23 }
  0x3b   : > { %p867_p0 = pnand %p866_p12, %p865_p8 }
  0x3c   : > { %p872_p9 = por %p871_p7, %p870_p2 }
  0x3d   : > { %p868_p5 = pneg %p867_p0 }
  0x3e   : > { %p874_p13 = por %p873_p11, %p872_p9 }
  0x40   : > { %p875_p4 = pnand %p874_p13, %p868_p5 }
  0x42   : > { %878 = shalt.err (!%p875_p4)
}
  0x43   : > { %s879_s14 = scalar_lea.vmem %s1145_s12, 2048  ;;  %s985_s15 = smov [#allocation5]  }
  0x44   : > { %p880_p1 = scmp.ne.s32.totalorder %s1145_s12, %s879_s14  ;;  %s884_s8 = sshll.u32 %s985_s15, 4  ;;  %s885_s8 = int_to_ptr.vmem [resolvable:$false] %s884_s8 }
  0x45   : > { %s886_s17 = scalar_lea.vmem %s885_s8, 4096  ;;  %p887_p8 = scmp.lt.s32.totalorder %s1145_s12, %s885_s8 }
  0x46   : > { %p882_p3 = pnand %p880_p1, %p866_p12  ;;  %p888_p0 = scmp.lt.s32.totalorder %s886_s17, %s879_s14 }
  0x48   : > { %p883_p6 = pneg %p882_p3  ;;  %p889_p2 = por %p888_p0, %p887_p8 }
  0x4a   : > { %p890_p7 = pnand %p889_p2, %p883_p6 }
  0x4c   : > { %893 = shalt.err (!%p890_p7)
}
  0x4d   : > { %s986_s7 = smov 256   ;;  %s1322_s24 = smov 8  }
  0x4e   : > { %s1323_s9 = smov 128   ;;  %p1324_p12 = scmp.ne.s32.totalorder %s1318_s6, 0 }
  0x4f   : > { %739 = dma.hbm_to_vmem [thread:$0]  (!%p1321_p10), %s1140_s23, 2048, %s1145_s12, %s1147_s27, %s986_s7, %s1323_s9, %s1322_s24  }
  0x50   : > { %253 = sbr.rel (%p1324_p12) target bundleno = 647 (0x287), region = 40  ;;  %p1325_p5 = scmp.ne.s32.totalorder (!%p1324_p12), %s1313_s26, 0 }
  0x57   : > { %947 = dma.done.wait (%p1325_p5), [#allocation3], 512  }
  0x58   : > { %949 = vsyncadd (%p1325_p5), [#allocation3], 4294966784  ;;  %s1184_s16 = sand.u32 1, %s964_s19   ;;  %p1326_p10 = scmp.ne.s32.totalorder %s1315_s28, 0 }
  0x59   : > { %s680_s10 = sshll.u32 %s1184_s16, 7  ;;  %s260_s25 = scalar_lea.sflag [#allocation6], %s1184_s16 }
  0x5a   : > { %s1188_s14 = scalar_lea.vmem [#allocation5], %s680_s10 }
  0x5b   : > { %951 = dma.done.wait (%p1326_p10), %s260_s25, 2048  }
  0x5c   : > { %953 = vsyncadd (%p1326_p10), %s260_s25, 4294965248  ;;  %v304_v0 = vld [vmem:[#allocation2] sm:$0xff]  ;;  %v306_v1 = vld [vmem:[#allocation2 + $0x10] sm:$0xff]  ;;  %v987_v33 = vmov 0   ;;  %s682_s27 = sshll.u32 %s972_s21, 1  ;;  %s681_s17 = sshll.u32 %s1184_s16, 6 }
  0x5d   : > { %v305_v2 = vld [vmem:[#allocation2 + $0x8] sm:$0xff]  ;;  %308 = vadd.xlane.f32.xlu0 %v304_v0  ;;  %312 = vadd.xlane.f32.xlu1 %v306_v1  ;;  %v307_v3 = vld [vmem:[#allocation2 + $0x18] sm:$0xff]  ;;  %v683_v51 = vld [vmem:[%s1297_s1] ss:$0 sm:$0xff]  ;;  %p297_p9 = scmp.lt.s32.totalorder %s682_s27, 3  ;;  %s293_s7 = scalar_lea.vmem [#allocation7], %s681_s17 }
  0x5e   : > { %v804_v4 = vld [vmem:[%s1188_s14 + $0x4] ss:$8 sps:$4 sm:$0xff]   ;;  %v806_v5 = vld [vmem:[%s1188_s14] ss:$8 sps:$4 sm:$0xff]   ;;  %v807_v6 = vld [vmem:[%s1188_s14 + $0x14] ss:$8 sps:$4 sm:$0xff]   ;;  %517 = vmatprep.mubr.bf16.mxu0 %v987_v33  ;;  %527 = vmatprep.mubr.bf16.mxu1 %v987_v33 }
  0x5f   : > { %485 = vmatprep.subr.bf16.mxu0 %v804_v4  ;;  %708 = vmatprep.subr.bf16.mxu1 %v804_v4  ;;  %v809_v23 = vld [vmem:[%s1188_s14 + $0x10] ss:$8 sps:$4 sm:$0xff]   ;;  %v810_v24 = vld [vmem:[%s1188_s14 + $0x24] ss:$8 sps:$4 sm:$0xff]   ;;  %v812_v25 = vld [vmem:[%s1188_s14 + $0x20] ss:$8 sps:$4 sm:$0xff]  }
  0x60   : > { %486 = vmatpush1.bf16.msra.mxu0 %v806_v5  ;;  %716 = vmatpush1.bf16.msra.mxu1 %v806_v5  ;;  %v813_v26 = vld [vmem:[%s1188_s14 + $0x34] ss:$8 sps:$4 sm:$0xff]   ;;  %v815_v27 = vld [vmem:[%s1188_s14 + $0x30] ss:$8 sps:$4 sm:$0xff]   ;;  %v816_v28 = vld [vmem:[%s1188_s14 + $0x44] ss:$8 sps:$4 sm:$0xff]   ;;  %v395_v5 = vlaneseq }
  0x61   : > { %310 = vadd.xlane.f32.xlu0 %v305_v2  ;;  %314 = vadd.xlane.f32.xlu1 %v307_v3  ;;  %v818_v29 = vld [vmem:[%s1188_s14 + $0x40] ss:$8 sps:$4 sm:$0xff]   ;;  %v819_v30 = vld [vmem:[%s1188_s14 + $0x54] ss:$8 sps:$4 sm:$0xff]   ;;  %v821_v31 = vld [vmem:[%s1188_s14 + $0x50] ss:$8 sps:$4 sm:$0xff]  }
  0x62   : > { %487 = vmatprep.subr.bf16.mxu0 %v807_v6  ;;  %709 = vmatprep.subr.bf16.mxu1 %v807_v6  ;;  %v822_v32 = vld [vmem:[%s1188_s14 + $0x64] ss:$8 sps:$4 sm:$0xff]   ;;  %v824_v34 = vld [vmem:[%s1188_s14 + $0x60] ss:$8 sps:$4 sm:$0xff]   ;;  %v825_v35 = vld [vmem:[%s1188_s14 + $0x74] ss:$8 sps:$4 sm:$0xff]  }
  0x63   : > { %v827_v36 = vld [vmem:[%s1188_s14 + $0x70] ss:$8 sps:$4 sm:$0xff]   ;;  %v684_v56 = vld [vmem:[%s1298_s2] ss:$0 sm:$0xff]  ;;  %s1339_s27 = smov (!%p297_p9, %s682_s27), 3  ;;  %v396_v6 = vshrl.u32 %v395_v5, 7 }
  0x64   : > { %488 = vmatpush1.bf16.msra.mxu0 %v809_v23  ;;  %717 = vmatpush1.bf16.msra.mxu1 %v809_v23  ;;  %s299_s8 = scalar_lea.vmem %s1300_s4, %s1339_s27  ;;  %s563_s24 = sshll.u32 %s293_s7, 4  ;;  %s1242_s24 = int_to_ptr.vmem [resolvable:$true] %s563_s24 }
  0x65   : > { %489 = vmatprep.subr.bf16.mxu0 %v810_v24  ;;  %710 = vmatprep.subr.bf16.mxu1 %v810_v24  ;;  %s707_s9 = sshll.u32 %s972_s21, 8  ;;  %s547_s14 = scalar_lea.sflag [#allocation4], %s1184_s16 }
  0x66   : > { %s1247_s21 = scalar_lea.hbm %s1301_s5, %s707_s9  ;;  %s894_s23 = scalar_lea.vmem %s1242_s24, 1024 }
  0x67   : > { %p895_p11 = scmp.ne.s32.totalorder %s1242_s24, %s894_s23  ;;  %p1327_p13 = scmp.ne.s32.totalorder %s1316_s29, 0 }
  0x68   : > { %490 = vmatpush1.bf16.msra.mxu0 %v812_v25  ;;  %718 = vmatpush1.bf16.msra.mxu1 %v812_v25  ;;  %s988_s26 = smov [#allocation7]  }
  0x69   : > { %491 = vmatprep.subr.bf16.mxu0 %v813_v26  ;;  %711 = vmatprep.subr.bf16.mxu1 %v813_v26  ;;  %p896_p4 = pnand %p895_p11, %p1327_p13  ;;  %s898_s28 = sshll.u32 %s988_s26, 4  ;;  %s899_s28 = int_to_ptr.vmem [resolvable:$false] %s898_s28 }
  0x6a   : > { %s900_s6 = scalar_lea.vmem %s899_s28, 2048  ;;  %p901_p3 = scmp.lt.s32.totalorder %s1242_s24, %s899_s28 }
  0x6b   : > { %p897_p1 = pneg %p896_p4  ;;  %p902_p6 = scmp.lt.s32.totalorder %s900_s6, %s894_s23 }
  0x6c   : > { %492 = vmatpush1.bf16.msra.mxu0 %v815_v27  ;;  %719 = vmatpush1.bf16.msra.mxu1 %v815_v27 }
  0x6d   : > { %493 = vmatprep.subr.bf16.mxu0 %v816_v28  ;;  %712 = vmatprep.subr.bf16.mxu1 %v816_v28  ;;  %p903_p8 = por %p902_p6, %p901_p3 }
  0x6f   : > { %p904_p0 = pnand %p903_p8, %p897_p1 }
  0x70   : > { %494 = vmatpush1.bf16.msra.mxu0 %v818_v29  ;;  %720 = vmatpush1.bf16.msra.mxu1 %v818_v29 }
  0x71   : > { %495 = vmatprep.subr.bf16.mxu0 %v819_v30  ;;  %713 = vmatprep.subr.bf16.mxu1 %v819_v30 }
  0x74   : > { %496 = vmatpush1.bf16.msra.mxu0 %v821_v31  ;;  %721 = vmatpush1.bf16.msra.mxu1 %v821_v31 }
  0x75   : > { %497 = vmatprep.subr.bf16.mxu0 %v822_v32  ;;  %714 = vmatprep.subr.bf16.mxu1 %v822_v32 }
  0x78   : > { %498 = vmatpush1.bf16.msra.mxu0 %v824_v34  ;;  %722 = vmatpush1.bf16.msra.mxu1 %v824_v34 }
  0x79   : > { %499 = vmatprep.subr.bf16.mxu0 %v825_v35  ;;  %715 = vmatprep.subr.bf16.mxu1 %v825_v35 }
  0x7c   : > { %500 = vmatpush1.bf16.msra.mxu0 %v827_v36  ;;  %723 = vmatpush1.bf16.msra.mxu1 %v827_v36 }
  0xea   : > { %v309_v7 = vpop.xlane.xlu0 %308  ;;  %v313_v8 = vpop.xlane.xlu1 %312 }
  0xeb   : > { %v317_v9 = vmul.f32 0.0078125, %v309_v7  ;;  %v319_v10 = vmul.f32 0.0078125, %v313_v8  ;;  %v397_v7 = vsub.s32 0, %v396_v6  ;;  %v393_v8 = vld [vmem:[%s299_s8] sm:$0x3] }
  0xed   : > { %v1197_v11 = vsub.f32 %v304_v0, %v317_v9  ;;  %v1199_v12 = vsub.f32 %v306_v1, %v319_v10  ;;  %v401_v9 = vsub.s32 1, %v396_v6  ;;  %v398_v10 = vrot.slane %v393_v8, %v397_v7 }
  0xee   : > { %v311_v13 = vpop.xlane.xlu0 %310  ;;  %v315_v14 = vpop.xlane.xlu1 %314 }
  0xef   : > { %v318_v15 = vmul.f32 0.0078125, %v311_v13  ;;  %v325_v16 = vmul.f32 %v1197_v11, %v1197_v11  ;;  %v320_v17 = vmul.f32 0.0078125, %v315_v14  ;;  %v327_v20 = vmul.f32 %v1199_v12, %v1199_v12 }
  0xf1   : > { %v1203_v18 = vsub.f32 %v305_v2, %v318_v15  ;;  %329 = vadd.xlane.f32.xlu0 %v325_v16  ;;  %v1205_v19 = vsub.f32 %v307_v3, %v320_v17 }
  0xf3   : > { %v326_v21 = vmul.f32 %v1203_v18, %v1203_v18  ;;  %v328_v22 = vmul.f32 %v1205_v19, %v1205_v19 }
  0xf5   : > { %333 = vadd.xlane.f32.xlu0 %v327_v20  ;;  %331 = vadd.xlane.f32.xlu1 %v326_v21 }
  0xf9   : > { %335 = vadd.xlane.f32.xlu1 %v328_v22 }
 0x17e   : > { %v330_v37 = vpop.xlane.xlu0 %329 }
 0x17f   : > { %v337_v38 = vmul.f32 0.0078125, %v330_v37 }
 0x181   : > { %v341_v39 = vadd.f32 1e-05, %v337_v38 }
 0x182   : > { %v332_v40 = vpop.xlane.xlu1 %331  ;;  %v334_v41 = vpop.xlane.xlu0 %333 }
 0x183   : > { %828 = vrsqrt.f32 %v341_v39  ;;  %v338_v42 = vmul.f32 0.0078125, %v332_v40  ;;  %v339_v43 = vmul.f32 0.0078125, %v334_v41 }
 0x185   : > { %v342_v44 = vadd.f32 1e-05, %v338_v42  ;;  %v343_v45 = vadd.f32 1e-05, %v339_v43 }
 0x186   : > { %v336_v46 = vpop.xlane.xlu1 %335 }
 0x187   : > { %830 = vrsqrt.f32 %v342_v44  ;;  %v340_v47 = vmul.f32 0.0078125, %v336_v46 }
 0x188   : > { %832 = vrsqrt.f32 %v343_v45 }
 0x189   : > { %v344_v48 = vadd.f32 1e-05, %v340_v47 }
 0x18b   : > { %834 = vrsqrt.f32 %v344_v48 }
 0x18d   : > { %v829_v49 = vpop.eup %828 }
 0x18e   : > { %v349_v50 = vmul.f32 %v829_v49, %v1197_v11  ;;  %v402_v11 = vrot.slane %v393_v8, %v401_v9 }
 0x190   : > { %v360_v55 = vmul.f32 %v683_v51, %v349_v50 }
 0x191   : > { %v831_v52 = vpop.eup %830 }
 0x192   : > { %v833_v53 = vpop.eup %832  ;;  %v350_v54 = vmul.f32 %v831_v52, %v1203_v18  ;;  %v371_v60 = vadd.f32 %v684_v56, %v360_v55 }
 0x193   : > { %v351_v57 = vmul.f32 %v833_v53, %v1199_v12 }
 0x194   : > { %v361_v58 = vmul.f32 %v683_v51, %v350_v54 }
 0x195   : > { %v835_v59 = vpop.eup %834  ;;  %v362_v63 = vmul.f32 %v683_v51, %v351_v57 }
 0x196   : > { %v372_v61 = vadd.f32 %v684_v56, %v361_v58  ;;  %v352_v62 = vmul.f32 %v835_v59, %v1205_v19 }
 0x197   : > { %v373_v2 = vadd.f32 %v684_v56, %v362_v63 }
 0x198   : > { %v375_v0 = vpack.c.bf16 %v372_v61, %v371_v60  ;;  %v363_v1 = vmul.f32 %v683_v51, %v352_v62 }
 0x19a   : > { %518 = vmatmul.mubr.bf16.vlgmr.msra.gmra.mrb[0].mxu0 %v375_v0  ;;  %v374_v3 = vadd.f32 %v684_v56, %v363_v1 }
 0x19c   : > { %v376_v4 = vpack.c.bf16 %v374_v3, %v373_v2 }
 0x19e   : > { %528 = vmatmul.mubr.bf16.vlgmr.msra.gmra.mrb[0].mxu1 %v376_v4 }
 0x26d   : > { %v519_v12 = vpop.f32.mrb[0].mxu0 }
 0x26e   : > { %v520_v13 = vadd.f32 %v519_v12, %v398_v10  ;;  %v521_v14 = vpop.f32.mrb[1].mxu0 }
 0x26f   : > { %v522_v15 = vadd.f32 %v521_v14, %v402_v11  ;;  %v523_v16 = vpop.f32.mrb[2].mxu0 }
 0x270   : > { %538 = vst [vmem:[%s293_s7] sm:$0xff] %v520_v13  ;;  %v524_v17 = vadd.f32 %v523_v16, %v398_v10  ;;  %v525_v18 = vpop.f32.mrb[3].mxu0 }
 0x271   : > { %539 = vst [vmem:[%s293_s7 + $0x8] sm:$0xff] %v522_v15  ;;  %v526_v19 = vadd.f32 %v525_v18, %v402_v11  ;;  %v529_v20 = vpop.f32.mrb[0].mxu1 }
 0x272   : > { %540 = vst [vmem:[%s293_s7 + $0x10] sm:$0xff] %v524_v17  ;;  %v530_v21 = vadd.f32 %v529_v20, %v398_v10  ;;  %v531_v22 = vpop.f32.mrb[1].mxu1 }
 0x273   : > { %541 = vst [vmem:[%s293_s7 + $0x18] sm:$0xff] %v526_v19  ;;  %v532_v23 = vadd.f32 %v531_v22, %v402_v11  ;;  %v533_v24 = vpop.f32.mrb[2].mxu1 }
 0x274   : > { %542 = vst [vmem:[%s293_s7 + $0x20] sm:$0xff] %v530_v21  ;;  %v534_v25 = vadd.f32 %v533_v24, %v398_v10  ;;  %v535_v26 = vpop.f32.mrb[3].mxu1 }
 0x275   : > { %543 = vst [vmem:[%s293_s7 + $0x28] sm:$0xff] %v532_v23  ;;  %v536_v27 = vadd.f32 %v535_v26, %v402_v11 }
 0x276   : > { %544 = vst [vmem:[%s293_s7 + $0x30] sm:$0xff] %v534_v25 }
 0x277   : > { %545 = vst [vmem:[%s293_s7 + $0x38] sm:$0xff] %v536_v27 }
 0x278   : > { %907 = shalt.err (!%p904_p0)
}
 0x279   : > { %s908_s27 = scalar_lea.hbm %s1247_s21, 1024  ;;  %s912_s8 = scalar_lea.hbm %s1301_s5, 2048 }
 0x27a   : > { %p909_p2 = scmp.ne.s32.totalorder %s1247_s21, %s908_s27  ;;  %p913_p5 = scmp.lt.u32.totalorder %s1247_s21, %s1301_s5 }
 0x27b   : > { %p914_p10 = scmp.lt.u32.totalorder %s912_s8, %s908_s27  ;;  %p916_p11 = scmp.lt.u32.totalorder %s908_s27, %s1247_s21 }
 0x27c   : > { %p910_p7 = pnand %p909_p2, %p1327_p13 }
 0x27d   : > { %p915_p9 = por %p914_p10, %p913_p5 }
 0x27e   : > { %p911_p12 = pneg %p910_p7 }
 0x27f   : > { %p917_p4 = por %p916_p11, %p915_p9 }
 0x281   : > { %p918_p1 = pnand %p917_p4, %p911_p12 }
 0x283   : > { %921 = shalt.err (!%p918_p1)
}
 0x284   : > { %s989_s9 = smov 256   ;;  %s990_s10 = smov 512  }
 0x285   : > { %s991_s25 = smov 16  }
 0x286   : > { %730 = dma.vmem_to_hbm [thread:$0]  (%p1327_p13), %s1242_s24, 1024, %s1247_s21, %s547_s14, %s989_s9, %s990_s10, %s991_s25  }
 0x287 PF: > { %s1328_s23 = sld [smem:[#allocation11_spill]]  ;;  %s578_s26 = sand.u32 1, %s960_s18  }
 0x288   : > { %p1329_p3 = scmp.ne.s32.totalorder %s1317_s30, 0  ;;  %s579_s28 = scalar_lea.sflag [#allocation4], %s578_s26 }
 0x28d   : > { %p1330_p6 = scmp.ge.s32.totalorder %s1328_s23, 2 }
 0x28f   : > { %p741_p8 = pnand %p1330_p6, %p1329_p3 }
 0x291   : > { %955 = dma.done.wait (!%p741_p8), %s579_s28, 1024  }
 0x292   : > { %957 = vsyncadd (!%p741_p8), %s579_s28, 4294966272  ;;  %s22_s23 = sadd.s32 1, %s1328_s23   ;;  %s1331_s18 = smov %s964_s19 }
 0x293   : > { %p19_p0 = scmp.ge.s32.totalorder %s22_s23, 4   ;;  %s1332_s19 = smov %s968_s20 }
 0x294   : > { %s1333_s20 = smov %s1143_s13  ;;  %s1334_s21 = smov %s976_s22 }
 0x295   : > { %s1335_s22 = smov %s1337_s11  ;;  %21 = sbr.rel (!%p19_p0) target bundleno = 7 (0x7), region = 94 }
 0x29c   :  { %584 = vsyncpa [#allocation3], 1 }
 0x29d   :  { %586 = vsyncpa [#allocation3 + $0x1], 1 }
 0x29e   :  { %587 = vsyncpa [#allocation6], 1 }
 0x29f   :  { %589 = vsyncpa [#allocation6 + $0x1], 1 }
 0x2a0   :  { %590 = vsyncpa [#allocation4], 1 }
 0x2a1   :  { %592 = vsyncpa [#allocation4 + $0x1], 1 }

</bundles_post_ra>
